<compile_context>
chip_gen: v7x
topology: tpu7x:2x2x1
jax: 0.10.0
libtpu: 0.0.40
codegen_flags: <defaults>
</compile_context>

<pallas_src>
import functools

import jax
import jax.numpy as jnp
from jax.experimental import pallas as pl
from jax.experimental.pallas import tpu as pltpu


def _add_pe_kernel(x_ref, pe_ref, o_ref, *, batch):
    # x_ref/o_ref: (TT, B*D); pe_ref: (TT, D).
    pe = pe_ref[...].astype(x_ref.dtype)          # cast in-kernel (free filler)
    if batch > 1:
        # Tile pe along the lane axis so it lines up with the folded (B*D)
        # slab: out[t, b*D + d] = x[t, b*D + d] + pe[t, d].
        pe = jnp.concatenate([pe] * batch, axis=-1)
    o_ref[...] = x_ref[...] + pe


def _chip_tuning():
    """Returns (target x-tile bytes, #TensorCores sharing a 'parallel' grid axis)."""
    try:
        kind = jax.devices()[0].device_kind.lower()
    except Exception:
        kind = ""
    if "v7" in kind:
        # ~3.2 TB/s per TC drains small tiles in <1us, so use bigger tiles to
        # amortize the ~0.35us per-step overhead.  4 x 6 MiB (in+out, double
        # buffered) + pe stays under the 32 MiB scoped-VMEM default.
        return 6 << 20, 2
    if "v6" in kind:
        return 4 << 20, 1   # 32 MiB scoped default fits 4 x 4 MiB + pe easily
    # v5e (and unknown chips): 16 MiB scoped default -> 2 MiB is the safe
    # no-override ceiling for (in + out) x 2 buffers.
    return 2 << 20, 1


def _pick_tile(T, row_bytes, target_bytes, num_cores):
    """Rows of T per grid step."""
    tt = max(1, min(T, target_bytes // max(row_bytes, 1)))
    total_bytes = T * row_bytes
    if num_cores > 1 and total_bytes >= (4 << 20):
        # Megacore (v7x): require >= 2 grid steps per core so each TC can still
        # pipeline (prefetch / writeback overlap).  Skip the split entirely for
        # tiny inputs, where it would only add per-step overhead.
        min_steps = 2 * num_cores
        tt = min(tt, max(1, pl.cdiv(T, min_steps)))
    if tt >= 8:
        tt -= tt % 8        # sublane-aligned T-tiles keep x/pe blocks fully packed
    return tt


def learned_positional_encoding(x, pe, dropout_p=0.0):
    """x: (T, B, D); pe: (max_len, 1, D) or (max_len, D). Returns dropout(x + pe[:T])."""
    if dropout_p != 0.0:
        # TODO(synk): training-mode dropout via pltpu.prng_seed + pltpu.prng_random_bits.
        raise NotImplementedError("nonzero dropout not implemented (module default is 0.0)")

    T, B, D = x.shape
    max_len = pe.shape[0]
    if T > max_len:
        raise ValueError(f"seq_len {T} exceeds max_len {max_len}")

    # Free, layout-preserving reshapes (no extra HBM pass): fold batch into the
    # lane axis for x/out, squeeze pe's size-1 batch dim.
    x2 = x.reshape(T, B * D)
    pe2 = pe.reshape(max_len, D)

    target_bytes, num_cores = _chip_tuning()
    row_bytes = B * D * x.dtype.itemsize
    TT = _pick_tile(T, row_bytes, target_bytes, num_cores)
    grid = (pl.cdiv(T, TT),)

    # Block last dims equal the full array dims, so they are legal for any B/D;
    # pe is read as dense (TT, D) blocks (no padded size-1 sublane).  Ragged
    # last blocks (T not a multiple of TT) are masked by Pallas on the output
    # side, so stray pe rows past T are harmless.
    out2 = pl.pallas_call(
        functools.partial(_add_pe_kernel, batch=B),
        out_shape=jax.ShapeDtypeStruct((T, B * D), x.dtype),
        grid_spec=pltpu.PrefetchScalarGridSpec(
            num_scalar_prefetch=0,
            grid=grid,
            in_specs=[
                pl.BlockSpec((TT, B * D), lambda t: (t, 0)),
                pl.BlockSpec((TT, D), lambda t: (t, 0)),
            ],
            out_specs=pl.BlockSpec((TT, B * D), lambda t: (t, 0)),
        ),
        compiler_params=pltpu.CompilerParams(
            dimension_semantics=("parallel",),
        ),
    )(x2, pe2)

    return out2.reshape(T, B, D)


if __name__ == "__main__":
    key = jax.random.PRNGKey(0)
    k_x, k_pe = jax.random.split(key)

    # Small shapes consistent with the module; d_model=128 and batch=8 keep the
    # folded (T, B*D) slab lane-dense (unmasked stores) for f32.
    max_len, d_model = 16, 128
    T, B = 8, 8

    # Deterministic parameter init mirroring nn.init.trunc_normal_ (std=1, cut at +/-2).
    pe = jax.random.truncated_normal(
        k_pe, -2.0, 2.0, shape=(max_len, 1, d_model), dtype=jnp.float32
    )
    x = jax.random.normal(k_x, (T, B, d_model), dtype=jnp.float32)

    out = jax.block_until_ready(learned_positional_encoding(x, pe))

    # Reference check (plain JAX): x + pe[:T] broadcast over batch.
    ref = x + pe[:T]
    assert out.shape == (T, B, d_model)
    assert jnp.allclose(out, ref, atol=1e-6), "mismatch vs reference"

    print("KERNEL_OK")
</pallas_src>

<mosaic_0001>
module attributes {stable_mosaic.version = 11 : i64} {
  func.func @_add_pe_kernel(%arg0: i32, %arg1: memref<8x1024xf32, #tpu.memory_space<vmem>>, %arg2: memref<8x128xf32, #tpu.memory_space<vmem>>, %arg3: memref<8x1024xf32, #tpu.memory_space<vmem>>) attributes {dimension_semantics = [#tpu.dimension_semantics<parallel>], iteration_bounds = array<i64: 1>, scalar_prefetch = 0 : i64, scratch_operands = 0 : i64, tpu.core_type = #tpu.core_type<tc>, window_params = [{transform_indices = @transform_0, window_bounds = array<i64: 8, 1024>}, {transform_indices = @transform_1, window_bounds = array<i64: 8, 128>}, {transform_indices = @transform_2, window_bounds = array<i64: 8, 1024>}]} {
    %c0 = arith.constant 0 : index
    %c0_0 = arith.constant 0 : index
    %0 = vector.load %arg2[%c0, %c0_0] : memref<8x128xf32, #tpu.memory_space<vmem>>, vector<8x128xf32>
    %1 = tpu.concatenate %0, %0, %0, %0, %0, %0, %0, %0 in 1 : vector<8x128xf32>, vector<8x128xf32>, vector<8x128xf32>, vector<8x128xf32>, vector<8x128xf32>, vector<8x128xf32>, vector<8x128xf32>, vector<8x128xf32> -> vector<8x1024xf32>
    %c0_1 = arith.constant 0 : index
    %c0_2 = arith.constant 0 : index
    %2 = vector.load %arg1[%c0_1, %c0_2] : memref<8x1024xf32, #tpu.memory_space<vmem>>, vector<8x1024xf32>
    %3 = arith.addf %2, %1 : vector<8x1024xf32>
    %c0_3 = arith.constant 0 : index
    %c0_4 = arith.constant 0 : index
    %4 = vector.load %arg3[%c0_3, %c0_4] : memref<8x1024xf32, #tpu.memory_space<vmem>>, vector<8x1024xf32>
    tpu.vector_store %arg3[%c0_3, %c0_4], %3 {strides = array<i32>} : memref<8x1024xf32, #tpu.memory_space<vmem>>, vector<8x1024xf32>,
    return
  }
  func.func @transform_0(%arg0: i32) -> (i32, i32) {
    %c0_i32 = arith.constant 0 : i32
    %c0_i32_0 = arith.constant 0 : i32
    return %arg0, %c0_i32 : i32, i32
  }
  func.func @transform_1(%arg0: i32) -> (i32, i32) {
    %c0_i32 = arith.constant 0 : i32
    %c0_i32_0 = arith.constant 0 : i32
    return %arg0, %c0_i32 : i32, i32
  }
  func.func @transform_2(%arg0: i32) -> (i32, i32) {
    %c0_i32 = arith.constant 0 : i32
    %c0_i32_0 = arith.constant 0 : i32
    return %arg0, %c0_i32 : i32, i32
  }
}

</mosaic_0001>

<bundles_post_ra>
// kernel: tpu_custom_call.1
= control target key start
LH: loop header
LB: loop body
LE: loop exit
PB: predicated region body
PF: predicated region fallthrough
CT: control target
= control target key end

     0   :  { %7 = vsyncpa [#allocation3], 0  ;;  %s216_s0 = inlined_call_operand.hbm [shape: f32[8,1024], index: 0, kind: input, shape index: {}]   ;;  %s217_s1 = inlined_call_operand.hbm [shape: f32[16,128], index: 1, kind: input, shape index: {}]   ;;  %s218_s2 = inlined_call_operand.hbm [shape: f32[8,1024], index: 2, kind: output, shape index: {}]  }
   0x1   :  { %8 = vsyncpa [#allocation6], 0 }
   0x2   :  { %9 = vsyncpa [#allocation4], 0  ;;  %s152_s9 = smov [#allocation2]   ;;  %s153_s11 = smov [#allocation5]  }
   0x3   :  { %s16_s10 = sshll.u32 %s152_s9, 4  ;;  %s26_s12 = sshll.u32 %s153_s11, 4  ;;  %s17_s10 = int_to_ptr.vmem [resolvable:$true] %s16_s10  ;;  %s170_s12 = int_to_ptr.vmem [resolvable:$true] %s26_s12 }
   0x4   :  { %s80_s15 = scalar_lea.hbm %s216_s0, 1024 }
   0x5   :  { %p81_p0 = scmp.ne.s32.totalorder %s216_s0, %s80_s15  ;;  %p84_p1 = scmp.lt.u32.totalorder %s80_s15, %s216_s0 }
   0x7   :  { %p86_p2 = pnand %p84_p1, %p81_p0 }
   0x9   :  { %89 = shalt.err (!%p86_p2)
}
   0xa   :  { %s90_s20 = scalar_lea.vmem %s17_s10, 1024  ;;  %p95_p4 = scmp.lt.s32.totalorder %s17_s10, %s17_s10 }
   0xb   :  { %p91_p3 = scmp.ne.s32.totalorder %s17_s10, %s90_s20  ;;  %p96_p5 = scmp.lt.s32.totalorder %s90_s20, %s90_s20 }
   0xd   :  { %p97_p6 = por %p96_p5, %p95_p4 }
   0xf   :  { %p98_p7 = pnand %p97_p6, %p91_p3 }
  0x11   :  { %101 = shalt.err (!%p98_p7)
}
  0x12   :  { %19 = dma.hbm_to_vmem [thread:$0]  %s216_s0, 1024, %s17_s10, [#allocation3]  }
  0x13   :  { %s102_s25 = scalar_lea.hbm %s217_s1, 128  ;;  %s104_s30 = scalar_lea.hbm %s217_s1, 256 }
  0x14   :  { %p103_p8 = scmp.ne.s32.totalorder %s217_s1, %s102_s25  ;;  %p105_p9 = scmp.lt.u32.totalorder %s104_s30, %s102_s25 }
  0x15   :  { %p106_p10 = scmp.lt.u32.totalorder %s102_s25, %s217_s1 }
  0x17   :  { %p107_p11 = por %p106_p10, %p105_p9 }
  0x19   :  { %p108_p12 = pnand %p107_p11, %p103_p8 }
  0x1b   :  { %111 = shalt.err (!%p108_p12)
}
  0x1c   :  { %s112_s0 = scalar_lea.vmem %s170_s12, 128  ;;  %p117_p0 = scmp.lt.s32.totalorder %s170_s12, %s170_s12 }
  0x1d   :  { %p113_p13 = scmp.ne.s32.totalorder %s170_s12, %s112_s0  ;;  %p118_p1 = scmp.lt.s32.totalorder %s112_s0, %s112_s0 }
  0x1f   :  { %p119_p2 = por %p118_p1, %p117_p0 }
  0x21   :  { %p120_p3 = pnand %p119_p2, %p113_p13 }
  0x23   :  { %123 = shalt.err (!%p120_p3)
}
  0x24   :  { %29 = dma.hbm_to_vmem [thread:$0]  %s217_s1, 128, %s170_s12, [#allocation6]  }
  0x25   :  { %146 = dma.done.wait [#allocation3], 1024  }
  0x26   :  { %147 = vsyncadd [#allocation3], 4294966272 }
  0x27   :  { %148 = dma.done.wait [#allocation6], 128  }
  0x28   :  { %149 = vsyncadd [#allocation6], 4294967168  ;;  %v36_v0 = vld [vmem:[#allocation5] sm:$0xff]  ;;  %v38_v2 = vld [vmem:[#allocation2 + $0x8] sm:$0xff]  ;;  %s154_s7 = smov [#allocation7]  }
  0x29   :  { %v37_v1 = vld [vmem:[#allocation2] sm:$0xff]  ;;  %s67_s8 = sshll.u32 %s154_s7, 4  ;;  %v46_v4 = vadd.f32 %v38_v2, %v36_v0  ;;  %v39_v5 = vld [vmem:[#allocation2 + $0x10] sm:$0xff]  ;;  %v40_v6 = vld [vmem:[#allocation2 + $0x18] sm:$0xff]  ;;  %s68_s8 = int_to_ptr.vmem [resolvable:$true] %s67_s8 }
  0x2a   :  { %v45_v3 = vadd.f32 %v37_v1, %v36_v0  ;;  %v41_v7 = vld [vmem:[#allocation2 + $0x20] sm:$0xff]  ;;  %v47_v8 = vadd.f32 %v39_v5, %v36_v0  ;;  %v48_v9 = vadd.f32 %v40_v6, %v36_v0  ;;  %v42_v11 = vld [vmem:[#allocation2 + $0x28] sm:$0xff]  ;;  %v43_v12 = vld [vmem:[#allocation2 + $0x30] sm:$0xff]  ;;  %s124_s1 = scalar_lea.vmem %s68_s8, 1024  ;;  %p129_p5 = scmp.lt.s32.totalorder %s68_s8, %s68_s8 }
  0x2b   :  { %v49_v10 = vadd.f32 %v41_v7, %v36_v0  ;;  %v44_v13 = vld [vmem:[#allocation2 + $0x38] sm:$0xff]  ;;  %54 = vst [vmem:[#allocation7 + $0x8] sm:$0xff] %v46_v4  ;;  %v50_v14 = vadd.f32 %v42_v11, %v36_v0  ;;  %v51_v15 = vadd.f32 %v43_v12, %v36_v0  ;;  %p125_p4 = scmp.ne.s32.totalorder %s68_s8, %s124_s1  ;;  %p130_p6 = scmp.lt.s32.totalorder %s124_s1, %s124_s1 }
  0x2c   :  { %53 = vst [vmem:[#allocation7] sm:$0xff] %v45_v3  ;;  %v52_v16 = vadd.f32 %v44_v13, %v36_v0  ;;  %55 = vst [vmem:[#allocation7 + $0x10] sm:$0xff] %v47_v8 }
  0x2d   :  { %56 = vst [vmem:[#allocation7 + $0x18] sm:$0xff] %v48_v9  ;;  %57 = vst [vmem:[#allocation7 + $0x20] sm:$0xff] %v49_v10  ;;  %p131_p7 = por %p130_p6, %p129_p5 }
  0x2e   :  { %58 = vst [vmem:[#allocation7 + $0x28] sm:$0xff] %v50_v14  ;;  %59 = vst [vmem:[#allocation7 + $0x30] sm:$0xff] %v51_v15 }
  0x2f   :  { %60 = vst [vmem:[#allocation7 + $0x38] sm:$0xff] %v52_v16  ;;  %p132_p8 = pnand %p131_p7, %p125_p4 }
  0x31   :  { %135 = shalt.err (!%p132_p8)
}
  0x32   :  { %s136_s11 = scalar_lea.hbm %s218_s2, 1024 }
  0x33   :  { %p137_p9 = scmp.ne.s32.totalorder %s218_s2, %s136_s11  ;;  %p140_p10 = scmp.lt.u32.totalorder %s136_s11, %s218_s2 }
  0x35   :  { %p142_p11 = pnand %p140_p10, %p137_p9 }
  0x37   :  { %145 = shalt.err (!%p142_p11)
}
  0x38   :  { %70 = dma.vmem_to_hbm [thread:$0]  %s68_s8, 1024, %s218_s2, [#allocation4]  }
  0x39   :  { %150 = dma.done.wait [#allocation4], 1024  }
  0x3a   :  { %151 = vsyncadd [#allocation4], 4294966272 }
  0x3b   :  { %74 = vsyncpa [#allocation3], 1 }
  0x3c   :  { %75 = vsyncpa [#allocation6], 1 }
  0x3d   :  { %76 = vsyncpa [#allocation4], 1 }

</bundles_post_ra>
